<compile_context>
chip_gen: v5e
topology: v5e:2x2
jax: 0.10.0
libtpu: 0.0.40
codegen_flags: <defaults>
</compile_context>

<pallas_src>
import functools

import jax
import jax.numpy as jnp
from jax.experimental import pallas as pl
from jax.experimental.pallas import tpu as pltpu


def _critic_kernel(x_ref,
                   w1_ref, b1_ref,
                   w2_ref, b2_ref,
                   w3_ref, b3_ref,
                   w4_ref, b4_ref,
                   o_ref):
    # x tile: (TB, S) bf16 ; weights bf16 ; biases f32 ; all math accumulated f32.
    x = x_ref[...]

    # layer 1: Linear + ReLU
    h = jnp.dot(x, w1_ref[...], preferred_element_type=jnp.float32) + b1_ref[...]
    h = jnp.maximum(h, 0.0)

    # layer 2: Linear + ReLU
    h = jnp.dot(h.astype(jnp.bfloat16), w2_ref[...],
                preferred_element_type=jnp.float32) + b2_ref[...]
    h = jnp.maximum(h, 0.0)

    # layer 3: Linear + Hardswish  (x * relu6(x + 3) / 6)
    h = jnp.dot(h.astype(jnp.bfloat16), w3_ref[...],
                preferred_element_type=jnp.float32) + b3_ref[...]
    h = h * jnp.clip(h + 3.0, 0.0, 6.0) * (1.0 / 6.0)

    # layer 4: Linear -> scalar value per row (b4 is a scalar read from SMEM)
    o = jnp.dot(h.astype(jnp.bfloat16), w4_ref[...],
                preferred_element_type=jnp.float32) + b4_ref[0, 0]
    o_ref[...] = o


@functools.partial(jax.jit, static_argnames=("tb_max",))
def critic_adv_ppo_forward(state, params, *, tb_max=512):
    """state: (B, state_dim) -> value: (B, 1) float32"""
    B, S = state.shape
    (w1, b1, w2, b2, w3, b3, w4, b4) = params
    M = w1.shape[1]

    # bf16 matmul operands (halves weight/activation DMA), f32 accumulation.
    x = state.astype(jnp.bfloat16)
    w1b, w2b, w3b, w4b = (w.astype(jnp.bfloat16) for w in (w1, w2, w3, w4))
    b1f, b2f, b3f, b4f = (b.astype(jnp.float32) for b in (b1, b2, b3, b4))

    # Batch tile: multiple of 8 sublanes, capped so tiles fit v7x's smaller VMEM.
    tb = min(tb_max, ((B + 7) // 8) * 8)
    grid = (pl.cdiv(B, tb),)

    def resident(a):  # weights/biases: same full block every grid step
        return pl.BlockSpec(a.shape, lambda i: (0,) * a.ndim)

    in_specs = [
        pl.BlockSpec((tb, S), lambda i: (i, 0)),            # x: tiled over batch
        resident(w1b), resident(b1f),
        resident(w2b), resident(b2f),
        resident(w3b), resident(b3f),
        resident(w4b),
        pl.BlockSpec(memory_space=pltpu.MemorySpace.SMEM),  # b4: (1,1) scalar
    ]
    out_specs = pl.BlockSpec((tb, 1), lambda i: (i, 0))
    # TODO(synk): a (1, TB) lane-major output slab would make the final store
    # lane-dense; kept (B, 1) to match the PyTorch output layout.

    flops = 2 * B * (S * M + M * M + M * M + M)
    bytes_accessed = (x.size * 2
                      + sum(int(w.size) * 2 for w in (w1b, w2b, w3b, w4b))
                      + sum(int(b.size) * 4 for b in (b1f, b2f, b3f, b4f))
                      + B * 4)

    return pl.pallas_call(
        _critic_kernel,
        out_shape=jax.ShapeDtypeStruct((B, 1), jnp.float32),
        grid=grid,
        in_specs=in_specs,
        out_specs=out_specs,
        compiler_params=pltpu.CompilerParams(
            dimension_semantics=("parallel",)),
        cost_estimate=pl.CostEstimate(
            flops=flops, transcendentals=0, bytes_accessed=bytes_accessed),
    )(x, w1b, b1f, w2b, b2f, w3b, b3f, w4b, b4f)


def init_critic_params(key, state_dim, mid_dim):
    """PyTorch-Linear-style init: U(-1/sqrt(fan_in), 1/sqrt(fan_in)).

    Weights stored as (fan_in, fan_out) so forward is x @ W + b (consistent
    with the reference below)."""
    dims = [(state_dim, mid_dim),
            (mid_dim, mid_dim),
            (mid_dim, mid_dim),
            (mid_dim, 1)]
    params = []
    for (fan_in, fan_out) in dims:
        key, kw, kb = jax.random.split(key, 3)
        bound = 1.0 / (fan_in ** 0.5)
        w = jax.random.uniform(kw, (fan_in, fan_out), jnp.float32, -bound, bound)
        b = jax.random.uniform(kb, (1, fan_out), jnp.float32, -bound, bound)
        params += [w, b]
    return tuple(params)


def _reference_forward(state, params):
    """Pure-JAX f32 reference (same math as the PyTorch module)."""
    (w1, b1, w2, b2, w3, b3, w4, b4) = params
    x = state.astype(jnp.float32)
    h = jnp.maximum(x @ w1 + b1, 0.0)
    h = jnp.maximum(h @ w2 + b2, 0.0)
    h = h @ w3 + b3
    h = h * jnp.clip(h + 3.0, 0.0, 6.0) / 6.0
    return h @ w4 + b4


if __name__ == "__main__":
    # small shapes consistent with the module
    batch, state_dim, mid_dim = 16, 12, 128

    key = jax.random.PRNGKey(0)
    k_s, k_p = jax.random.split(key, 2)
    state = jax.random.normal(k_s, (batch, state_dim), jnp.float32)
    params = init_critic_params(k_p, state_dim, mid_dim)

    out = critic_adv_ppo_forward(state, params)
    out = jax.block_until_ready(out)

    ref = _reference_forward(state, params)
    assert out.shape == (batch, 1)
    # bf16 MXU inputs with f32 accumulation -> loosened tolerance vs f32 ref.
    assert jnp.allclose(out, ref, atol=5e-2, rtol=5e-2), (
        f"max abs err = {jnp.max(jnp.abs(out - ref))}")

    print("KERNEL_OK")
</pallas_src>

<mosaic_0001>
module attributes {stable_mosaic.version = 11 : i64} {
  func.func @_critic_kernel(%arg0: i32, %arg1: memref<16x12xbf16, #tpu.memory_space<vmem>>, %arg2: memref<12x128xbf16, #tpu.memory_space<vmem>>, %arg3: memref<1x128xf32, #tpu.memory_space<vmem>>, %arg4: memref<128x128xbf16, #tpu.memory_space<vmem>>, %arg5: memref<1x128xf32, #tpu.memory_space<vmem>>, %arg6: memref<128x128xbf16, #tpu.memory_space<vmem>>, %arg7: memref<1x128xf32, #tpu.memory_space<vmem>>, %arg8: memref<128x1xbf16, #tpu.memory_space<vmem>>, %arg9: memref<1x1xf32, #tpu.memory_space<smem>>, %arg10: memref<16x1xf32, #tpu.memory_space<vmem>>) attributes {dimension_semantics = [#tpu.dimension_semantics<parallel>], iteration_bounds = array<i64: 1>, scalar_prefetch = 0 : i64, scratch_operands = 0 : i64, tpu.core_type = #tpu.core_type<tc>, window_params = [{transform_indices = @transform_0, window_bounds = array<i64: 16, 12>}, {pipeline_mode = #tpu.pipeline_mode<synchronous>, transform_indices = @transform_1, window_bounds = array<i64: 12, 128>}, {pipeline_mode = #tpu.pipeline_mode<synchronous>, transform_indices = @transform_2, window_bounds = array<i64: 1, 128>}, {pipeline_mode = #tpu.pipeline_mode<synchronous>, transform_indices = @transform_3, window_bounds = array<i64: 128, 128>}, {pipeline_mode = #tpu.pipeline_mode<synchronous>, transform_indices = @transform_4, window_bounds = array<i64: 1, 128>}, {pipeline_mode = #tpu.pipeline_mode<synchronous>, transform_indices = @transform_5, window_bounds = array<i64: 128, 128>}, {pipeline_mode = #tpu.pipeline_mode<synchronous>, transform_indices = @transform_6, window_bounds = array<i64: 1, 128>}, {pipeline_mode = #tpu.pipeline_mode<synchronous>, transform_indices = @transform_7, window_bounds = array<i64: 128, 1>}, {transform_indices = @transform_8, window_bounds = array<i64: 1, 1>}, {transform_indices = @transform_9, window_bounds = array<i64: 16, 1>}]} {
    %c0 = arith.constant 0 : index
    %c0_0 = arith.constant 0 : index
    %0 = vector.load %arg1[%c0, %c0_0] : memref<16x12xbf16, #tpu.memory_space<vmem>>, vector<16x12xbf16>
    %c0_1 = arith.constant 0 : index
    %c0_2 = arith.constant 0 : index
    %1 = vector.load %arg2[%c0_1, %c0_2] : memref<12x128xbf16, #tpu.memory_space<vmem>>, vector<12x128xbf16>
    %cst = arith.constant dense<0.000000e+00> : vector<16x128xf32>
    %2 = tpu.matmul %0, %1, %cst {dimension_numbers = #tpu.dot_dimension_numbers<[1], [0], [0], [1], [0, 0, 1, 1], [], []>} : vector<16x12xbf16>, vector<12x128xbf16>, vector<16x128xf32> -> vector<16x128xf32>
    %c0_3 = arith.constant 0 : index
    %c0_4 = arith.constant 0 : index
    %3 = vector.load %arg3[%c0_3, %c0_4] : memref<1x128xf32, #tpu.memory_space<vmem>>, vector<1x128xf32>
    %4 = vector.broadcast %3 : vector<1x128xf32> to vector<16x128xf32>
    %5 = arith.addf %2, %4 : vector<16x128xf32>
    %cst_5 = arith.constant 0.000000e+00 : f32
    %6 = vector.broadcast %cst_5 : f32 to vector<16x128xf32>
    %7 = arith.maximumf %5, %6 : vector<16x128xf32>
    %8 = arith.truncf %7 : vector<16x128xf32> to vector<16x128xbf16>
    %c0_6 = arith.constant 0 : index
    %c0_7 = arith.constant 0 : index
    %9 = vector.load %arg4[%c0_6, %c0_7] : memref<128x128xbf16, #tpu.memory_space<vmem>>, vector<128x128xbf16>
    %cst_8 = arith.constant dense<0.000000e+00> : vector<16x128xf32>
    %10 = tpu.matmul %8, %9, %cst_8 {dimension_numbers = #tpu.dot_dimension_numbers<[1], [0], [0], [1], [0, 0, 1, 1], [], []>} : vector<16x128xbf16>, vector<128x128xbf16>, vector<16x128xf32> -> vector<16x128xf32>
    %c0_9 = arith.constant 0 : index
    %c0_10 = arith.constant 0 : index
    %11 = vector.load %arg5[%c0_9, %c0_10] : memref<1x128xf32, #tpu.memory_space<vmem>>, vector<1x128xf32>
    %12 = vector.broadcast %11 : vector<1x128xf32> to vector<16x128xf32>
    %13 = arith.addf %10, %12 : vector<16x128xf32>
    %cst_11 = arith.constant 0.000000e+00 : f32
    %14 = vector.broadcast %cst_11 : f32 to vector<16x128xf32>
    %15 = arith.maximumf %13, %14 : vector<16x128xf32>
    %16 = arith.truncf %15 : vector<16x128xf32> to vector<16x128xbf16>
    %c0_12 = arith.constant 0 : index
    %c0_13 = arith.constant 0 : index
    %17 = vector.load %arg6[%c0_12, %c0_13] : memref<128x128xbf16, #tpu.memory_space<vmem>>, vector<128x128xbf16>
    %cst_14 = arith.constant dense<0.000000e+00> : vector<16x128xf32>
    %18 = tpu.matmul %16, %17, %cst_14 {dimension_numbers = #tpu.dot_dimension_numbers<[1], [0], [0], [1], [0, 0, 1, 1], [], []>} : vector<16x128xbf16>, vector<128x128xbf16>, vector<16x128xf32> -> vector<16x128xf32>
    %c0_15 = arith.constant 0 : index
    %c0_16 = arith.constant 0 : index
    %19 = vector.load %arg7[%c0_15, %c0_16] : memref<1x128xf32, #tpu.memory_space<vmem>>, vector<1x128xf32>
    %20 = vector.broadcast %19 : vector<1x128xf32> to vector<16x128xf32>
    %21 = arith.addf %18, %20 : vector<16x128xf32>
    %cst_17 = arith.constant 3.000000e+00 : f32
    %22 = vector.broadcast %cst_17 : f32 to vector<16x128xf32>
    %23 = arith.addf %21, %22 : vector<16x128xf32>
    %cst_18 = arith.constant 0.000000e+00 : f32
    %cst_19 = arith.constant 6.000000e+00 : f32
    %24 = vector.broadcast %cst_18 : f32 to vector<16x128xf32>
    %25 = arith.maximumf %24, %23 : vector<16x128xf32>
    %26 = vector.broadcast %cst_19 : f32 to vector<16x128xf32>
    %27 = arith.minimumf %26, %25 : vector<16x128xf32>
    %28 = arith.mulf %21, %27 : vector<16x128xf32>
    %cst_20 = arith.constant 0.166666672 : f32
    %29 = vector.broadcast %cst_20 : f32 to vector<16x128xf32>
    %30 = arith.mulf %28, %29 : vector<16x128xf32>
    %31 = arith.truncf %30 : vector<16x128xf32> to vector<16x128xbf16>
    %c0_21 = arith.constant 0 : index
    %c0_22 = arith.constant 0 : index
    %32 = vector.load %arg8[%c0_21, %c0_22] : memref<128x1xbf16, #tpu.memory_space<vmem>>, vector<128x1xbf16>
    %cst_23 = arith.constant dense<0.000000e+00> : vector<16x1xf32>
    %33 = tpu.matmul %31, %32, %cst_23 {dimension_numbers = #tpu.dot_dimension_numbers<[1], [0], [0], [1], [0, 0, 1, 1], [], []>} : vector<16x128xbf16>, vector<128x1xbf16>, vector<16x1xf32> -> vector<16x1xf32>
    %c0_24 = arith.constant 0 : index
    %c0_25 = arith.constant 0 : index
    %34 = memref.load %arg9[%c0_24, %c0_25] : memref<1x1xf32, #tpu.memory_space<smem>>
    %35 = vector.broadcast %34 : f32 to vector<16x1xf32>
    %36 = arith.addf %33, %35 : vector<16x1xf32>
    %c0_26 = arith.constant 0 : index
    %c0_27 = arith.constant 0 : index
    %37 = vector.load %arg10[%c0_26, %c0_27] : memref<16x1xf32, #tpu.memory_space<vmem>>, vector<16x1xf32>
    tpu.vector_store %arg10[%c0_26, %c0_27], %36 {strides = array<i32>} : memref<16x1xf32, #tpu.memory_space<vmem>>, vector<16x1xf32>,
    return
  }
  func.func @transform_0(%arg0: i32) -> (i32, i32) {
    %c0_i32 = arith.constant 0 : i32
    %c0_i32_0 = arith.constant 0 : i32
    return %arg0, %c0_i32 : i32, i32
  }
  func.func @transform_1(%arg0: i32) -> (i32, i32) {
    %c0_i32 = arith.constant 0 : i32
    %c0_i32_0 = arith.constant 0 : i32
    %c0_i32_1 = arith.constant 0 : i32
    return %c0_i32, %c0_i32_0 : i32, i32
  }
  func.func @transform_2(%arg0: i32) -> (i32, i32) {
    %c0_i32 = arith.constant 0 : i32
    %c0_i32_0 = arith.constant 0 : i32
    %c0_i32_1 = arith.constant 0 : i32
    return %c0_i32, %c0_i32_0 : i32, i32
  }
  func.func @transform_3(%arg0: i32) -> (i32, i32) {
    %c0_i32 = arith.constant 0 : i32
    %c0_i32_0 = arith.constant 0 : i32
    %c0_i32_1 = arith.constant 0 : i32
    return %c0_i32, %c0_i32_0 : i32, i32
  }
  func.func @transform_4(%arg0: i32) -> (i32, i32) {
    %c0_i32 = arith.constant 0 : i32
    %c0_i32_0 = arith.constant 0 : i32
    %c0_i32_1 = arith.constant 0 : i32
    return %c0_i32, %c0_i32_0 : i32, i32
  }
  func.func @transform_5(%arg0: i32) -> (i32, i32) {
    %c0_i32 = arith.constant 0 : i32
    %c0_i32_0 = arith.constant 0 : i32
    %c0_i32_1 = arith.constant 0 : i32
    return %c0_i32, %c0_i32_0 : i32, i32
  }
  func.func @transform_6(%arg0: i32) -> (i32, i32) {
    %c0_i32 = arith.constant 0 : i32
    %c0_i32_0 = arith.constant 0 : i32
    %c0_i32_1 = arith.constant 0 : i32
    return %c0_i32, %c0_i32_0 : i32, i32
  }
  func.func @transform_7(%arg0: i32) -> (i32, i32) {
    %c0_i32 = arith.constant 0 : i32
    %c0_i32_0 = arith.constant 0 : i32
    %c0_i32_1 = arith.constant 0 : i32
    return %c0_i32, %c0_i32_0 : i32, i32
  }
  func.func @transform_8(%arg0: i32) -> (i32, i32) {
    %c0_i32 = arith.constant 0 : i32
    %c0_i32_0 = arith.constant 0 : i32
    %c0_i32_1 = arith.constant 0 : i32
    return %c0_i32, %c0_i32_0 : i32, i32
  }
  func.func @transform_9(%arg0: i32) -> (i32, i32) {
    %c0_i32 = arith.constant 0 : i32
    %c0_i32_0 = arith.constant 0 : i32
    return %arg0, %c0_i32 : i32, i32
  }
}

</mosaic_0001>

<bundles_post_ra>
// kernel: critic_adv_ppo_forward.1
= control target key start
LH: loop header
LB: loop body
LE: loop exit
PB: predicated region body
PF: predicated region fallthrough
CT: control target
= control target key end

     0   :  { %vm56_vm0 = vcmask 1045504   ;;  %vm52_vm1 = vcmask 97280   ;;  %vm335_vm2 = vcmask 7168   ;;  %s625_s1 = inlined_call_operand.vmem [shape: bf16[12,128], index: 1, kind: input, shape index: {}]   ;;  %s626_s3 = inlined_call_operand.vmem [shape: bf16[128,128], index: 3, kind: input, shape index: {}]   ;;  %s627_s0 = inlined_call_operand.vmem [shape: bf16[16,12], index: 0, kind: input, shape index: {}]   ;;  %s628_s2 = inlined_call_operand.vmem [shape: f32[1,128], index: 2, kind: input, shape index: {}]   ;;  %s629_s4 = inlined_call_operand.vmem [shape: f32[1,128], index: 4, kind: input, shape index: {}]   ;;  %s630_s5 = inlined_call_operand.vmem [shape: bf16[128,128], index: 5, kind: input, shape index: {}]   ;;  %s631_s6 = inlined_call_operand.vmem [shape: f32[1,128], index: 6, kind: input, shape index: {}]   ;;  %s632_s7 = inlined_call_operand.vmem [shape: bf16[128,1], index: 7, kind: input, shape index: {}]   ;;  %s633_s8 = inlined_call_operand.<no memory space> [shape: f32[1,1], index: 8, kind: input, shape index: {}]   ;;  %s634_s9 = inlined_call_operand.vmem [shape: f32[16,1], index: 9, kind: output, shape index: {}]  }
   0x1   :  { %v348_v0 = vld [vmem:[%s625_s1] sm:$0xf]  ;;  %v448_v1 = vld [vmem:[%s625_s1] sm:$0x30]  ;;  %v456_v3 = vld [vmem:[%s626_s3 + $0x38] sm:$0xff]  ;;  %v272_v61 = vstv %s633_s8 }
   0x2   :  { %v349_v2 = vor.u32 %v448_v1, %v348_v0  ;;  %v447_v5 = vld [vmem:[%s627_s0] sm:$0xff]  ;;  %145 = vmatpush.bf16.msra.mxu1 %v456_v3  ;;  %v455_v6 = vld [vmem:[%s626_s3 + $0x30] sm:$0xff]  ;;  %v454_v7 = vld [vmem:[%s626_s3 + $0x28] sm:$0xff] }
   0x3   :  { %v453_v8 = vld [vmem:[%s626_s3 + $0x20] sm:$0xff]  ;;  %v452_v9 = vld [vmem:[%s626_s3 + $0x18] sm:$0xff]  ;;  %v451_v10 = vld [vmem:[%s626_s3 + $0x10] sm:$0xff] }
   0x4   :  { %v58_v4 = vsel %vm56_vm0, %v349_v2, 0  ;;  %v450_v11 = vld [vmem:[%s626_s3 + $0x8] sm:$0xff]  ;;  %v449_v12 = vld [vmem:[%s626_s3] sm:$0xff]  ;;  %v464_v13 = vld [vmem:[%s630_s5 + $0x38] sm:$0xff] }
   0x5   :  { %67 = vmatpush.bf16.msra.mxu0 %v58_v4  ;;  %230 = vmatpush.bf16.msra.mxu2 %v464_v13  ;;  %v463_v14 = vld [vmem:[%s630_s5 + $0x30] sm:$0xff]  ;;  %v462_v15 = vld [vmem:[%s630_s5 + $0x28] sm:$0xff]  ;;  %v461_v16 = vld [vmem:[%s630_s5 + $0x20] sm:$0xff] }
   0x6   :  { %146 = vmatpush.bf16.msra.mxu1 %v455_v6  ;;  %v473_v18 = vld [vmem:[%s628_s2] ss:$0 sm:$0xff]  ;;  %v460_v25 = vld [vmem:[%s630_s5 + $0x18] sm:$0xff]  ;;  %v459_v26 = vld [vmem:[%s630_s5 + $0x10] sm:$0xff] }
   0x7   :  { %v458_v27 = vld [vmem:[%s630_s5 + $0x8] sm:$0xff]  ;;  %v457_v28 = vld [vmem:[%s630_s5] sm:$0xff]  ;;  %v472_v29 = vld [vmem:[%s632_s7 + $0x38] sm:$0xff] }
   0x8   :  { %350 = vmatmul.msk.bf16.vlgmr.msra.gmra.mxu0 %vm52_vm1, %v447_v5  ;;  %321 = vmatpush.bf16.msra.mxu3 %v472_v29  ;;  %v471_v30 = vld [vmem:[%s632_s7 + $0x30] sm:$0xff]  ;;  %v474_v32 = vld [vmem:[%s629_s4] ss:$0 sm:$0xff]  ;;  %v470_v39 = vld [vmem:[%s632_s7 + $0x28] sm:$0xff] }
   0x9   :  { %231 = vmatpush.bf16.msra.mxu2 %v463_v14  ;;  %v469_v40 = vld [vmem:[%s632_s7 + $0x20] sm:$0xff]  ;;  %v468_v41 = vld [vmem:[%s632_s7 + $0x18] sm:$0xff]  ;;  %v467_v42 = vld [vmem:[%s632_s7 + $0x10] sm:$0xff] }
   0xa   :  { %147 = vmatpush.bf16.msra.mxu1 %v454_v7  ;;  %v466_v43 = vld [vmem:[%s632_s7 + $0x8] sm:$0xff]  ;;  %v465_v44 = vld [vmem:[%s632_s7] sm:$0xff] }
   0xb   :  { %v475_v45 = vld [vmem:[%s631_s6] ss:$0 sm:$0xff] }
   0xc   :  { %322 = vmatpush.bf16.msra.mxu3 %v471_v30 }
   0xd   :  { %232 = vmatpush.bf16.msra.mxu2 %v462_v15 }
   0xe   :  { %148 = vmatpush.bf16.msra.mxu1 %v453_v8 }
  0x10   :  { %323 = vmatpush.bf16.msra.mxu3 %v470_v39 }
  0x11   :  { %233 = vmatpush.bf16.msra.mxu2 %v461_v16 }
  0x12   :  { %149 = vmatpush.bf16.msra.mxu1 %v452_v9 }
  0x14   :  { %324 = vmatpush.bf16.msra.mxu3 %v469_v40 }
  0x15   :  { %234 = vmatpush.bf16.msra.mxu2 %v460_v25 }
  0x16   :  { %150 = vmatpush.bf16.msra.mxu1 %v451_v10 }
  0x18   :  { %325 = vmatpush.bf16.msra.mxu3 %v468_v41 }
  0x19   :  { %235 = vmatpush.bf16.msra.mxu2 %v459_v26 }
  0x1a   :  { %151 = vmatpush.bf16.msra.mxu1 %v450_v11 }
  0x1c   :  { %326 = vmatpush.bf16.msra.mxu3 %v467_v42 }
  0x1d   :  { %236 = vmatpush.bf16.msra.mxu2 %v458_v27 }
  0x1e   :  { %152 = vmatpush.bf16.msra.mxu1 %v449_v12 }
  0x20   :  { %327 = vmatpush.bf16.msra.mxu3 %v466_v43 }
  0x21   :  { %237 = vmatpush.bf16.msra.mxu2 %v457_v28 }
  0x24   :  { %328 = vmatpush.bf16.msra.mxu3 %v465_v44 }
  0x85   :  { %v69_v17 = vpop.f32.mrf.mxu0 }
  0x86   :  { %v70_v19 = vadd.f32 %v473_v18, %v69_v17 }
  0x88   :  { %v74_v22 = vmax.f32 %v70_v19, 0.0 }
  0x8d   :  { %v71_v20 = vpop.f32.mrf.mxu0 }
  0x8e   :  { %v72_v21 = vadd.f32 %v473_v18, %v71_v20 }
  0x90   :  { %v75_v23 = vmax.f32 %v72_v21, 0.0 }
  0x92   :  { %v76_v24 = vpack.c.bf16 %v75_v23, %v74_v22 }
  0x94   :  { %153 = vmatmul.bf16.vlgmr.msra.gmra.mxu1 %v76_v24 }
 0x111   :  { %v154_v31 = vpop.f32.mrf.mxu1 }
 0x112   :  { %v155_v33 = vadd.f32 %v474_v32, %v154_v31 }
 0x114   :  { %v159_v36 = vmax.f32 %v155_v33, 0.0 }
 0x119   :  { %v156_v34 = vpop.f32.mrf.mxu1 }
 0x11a   :  { %v157_v35 = vadd.f32 %v474_v32, %v156_v34 }
 0x11c   :  { %v160_v37 = vmax.f32 %v157_v35, 0.0 }
 0x11e   :  { %v161_v38 = vpack.c.bf16 %v160_v37, %v159_v36 }
 0x120   :  { %238 = vmatmul.bf16.vlgmr.msra.gmra.mxu2 %v161_v38 }
 0x1a3   :  { %v239_v46 = vpop.f32.mrf.mxu2 }
 0x1a4   :  { %v240_v47 = vadd.f32 %v475_v45, %v239_v46 }
 0x1a6   :  { %v244_v48 = vadd.f32 3.0, %v240_v47 }
 0x1a8   :  { %v246_v49 = vmax.f32 %v244_v48, 0.0 }
 0x1aa   :  { %v248_v52 = vmin.f32 %v246_v49, 6.0 }
 0x1ab   :  { %v241_v50 = vpop.f32.mrf.mxu2 }
 0x1ac   :  { %v242_v51 = vadd.f32 %v475_v45, %v241_v50  ;;  %v250_v55 = vmul.f32 %v248_v52, %v240_v47 }
 0x1ae   :  { %v245_v53 = vadd.f32 3.0, %v242_v51  ;;  %v252_v58 = vmul.f32 0.16666667, %v250_v55 }
 0x1b0   :  { %v247_v54 = vmax.f32 %v245_v53, 0.0 }
 0x1b2   :  { %v249_v56 = vmin.f32 %v247_v54, 6.0 }
 0x1b4   :  { %v251_v57 = vmul.f32 %v249_v56, %v242_v51 }
 0x1b6   :  { %v253_v59 = vmul.f32 0.16666667, %v251_v57 }
 0x1b8   :  { %v254_v60 = vpack.c.bf16 %v253_v59, %v252_v58 }
 0x1ba   :  { %329 = vmatmul.bf16.vlgmr.msra.gmra.mxu3 %v254_v60 }
 0x23d   :  { %v330_v62 = vpop.f32.mrf.mxu3 }
 0x23e   :  { %v331_v63 = vadd.f32 %v330_v62, %v272_v61 }
 0x240   :  { %336 = vst.msk [vmem:[%s634_s9] sm:$0xff] %vm335_vm2, %v331_v63 }
 0x245   :  { %v332_v0 = vpop.f32.mrf.mxu3 }
 0x246   :  { %v333_v1 = vadd.f32 %v332_v0, %v272_v61 }
 0x248   :  { %337 = vst.msk [vmem:[%s634_s9 + $0x8] sm:$0xff] %vm335_vm2, %v333_v1 }

</bundles_post_ra>
